<compile_context>
chip_gen: v5e
topology: v5e:2x2
jax: 0.10.0
libtpu: 0.0.40
codegen_flags: <defaults>
</compile_context>

<pallas_src>
import functools

import jax
import jax.numpy as jnp
from jax import lax
from jax.experimental import pallas as pl
from jax.experimental.pallas import tpu as pltpu  # noqa: F401 (TPU backend)

LANE = 128  # vreg lane width: pad classifier output to a lane-dense slab


def _sgc_prop_first_kernel(a_ref, x_ref, norm_ref, w_ref, b_ref, o_ref):
    """Propagate-then-project (use when Fi <= Fo_pad).

    a_ref    : (N, N)      bf16 dense adjacency, A[i, j] = 1 iff edge j -> i
    x_ref    : (N, Fi)     bf16 node features
    norm_ref : (N, 1)      f32 precomputed D^{-1/2} (static graph attribute)
    w_ref    : (Fi, Fo_p)  bf16 classifier weight, zero-padded to lane width
    b_ref    : (1, Fo_p)   f32 bias, zero-padded
    o_ref    : (N, Fo_p)   f32 lane-dense output slab
    """
    norm = norm_ref[...]                                                  # (N, 1)
    # Source-side scaling on the (N, Fi) features (NOT on the N^2 adjacency).
    x_src = (x_ref[...].astype(jnp.float32) * norm).astype(jnp.bfloat16)  # (N, Fi)
    # Propagate (sum over in-neighbours), then destination-side post-scaling.
    agg = jnp.dot(a_ref[...], x_src, preferred_element_type=jnp.float32) * norm
    # Linear classifier into the padded, lane-dense output slab.
    o_ref[...] = jnp.dot(agg.astype(jnp.bfloat16), w_ref[...],
                         preferred_element_type=jnp.float32) + b_ref[...]


def _sgc_proj_first_kernel(a_ref, x_ref, norm_ref, w_ref, b_ref, o_ref):
    """Project-then-propagate (use when Fi > Fo_pad): N^2 term contracts over
    Fo_pad instead of Fi.  Mathematically identical (propagation is linear)."""
    norm = norm_ref[...]                                                  # (N, 1)
    xw = jnp.dot(x_ref[...], w_ref[...],
                 preferred_element_type=jnp.float32)                      # (N, Fo_p)
    xw_src = (xw * norm).astype(jnp.bfloat16)
    agg = jnp.dot(a_ref[...], xw_src, preferred_element_type=jnp.float32) * norm
    o_ref[...] = agg + b_ref[...]


@functools.partial(jax.jit, static_argnums=(5,))
def _sgc_forward(adj_bf16, x_bf16, norm, w_pad, b_pad, num_classes):
    n, fi = x_bf16.shape
    fo_pad = w_pad.shape[1]

    # Pick the matmul order that minimizes the dominant N^2 contraction.
    proj_first = fi > fo_pad
    kernel = _sgc_proj_first_kernel if proj_first else _sgc_prop_first_kernel

    nn_flops = 2 * n * n * (fo_pad if proj_first else fi)
    cost = pl.CostEstimate(
        flops=nn_flops + 2 * n * fi * fo_pad,
        transcendentals=0,  # rsqrt hoisted out of the kernel (static graph attr)
        bytes_accessed=(adj_bf16.size * 2 + x_bf16.size * 2 + norm.size * 4
                        + w_pad.size * 2 + b_pad.size * 4 + n * fo_pad * 4),
    )

    full = lambda shape: pl.BlockSpec(shape, lambda: (0,) * len(shape))

    out_pad = pl.pallas_call(
        kernel,
        out_shape=jax.ShapeDtypeStruct((n, fo_pad), jnp.float32),
        in_specs=[full(adj_bf16.shape), full(x_bf16.shape), full(norm.shape),
                  full(w_pad.shape), full(b_pad.shape)],
        out_specs=full((n, fo_pad)),
        cost_estimate=cost,
    )(adj_bf16, x_bf16, norm, w_pad, b_pad)

    # Layout plumbing only: drop the zero lane padding (fused inside this jit).
    return out_pad[:, :num_classes]


def sgc_forward(adj_bf16, x_bf16, norm, params):
    """Single fused pallas_call; returns (N, num_classes) f32 logits."""
    return _sgc_forward(adj_bf16, x_bf16, norm,
                        params["w_pad"], params["b_pad"], params["num_classes"])


def init_params(key, in_feats, num_classes):
    """Xavier-uniform Linear weight (DGL SGConv fc), zero bias, lane-padded."""
    limit = jnp.sqrt(6.0 / (in_feats + num_classes))
    w = jax.random.uniform(key, (in_feats, num_classes), jnp.float32, -limit, limit)
    fo_pad = ((num_classes + LANE - 1) // LANE) * LANE
    w_pad = jnp.zeros((in_feats, fo_pad), jnp.float32).at[:, :num_classes].set(w)
    return {
        "w_pad": w_pad.astype(jnp.bfloat16),
        "b_pad": jnp.zeros((1, fo_pad), jnp.float32),
        "num_classes": num_classes,
    }


def make_graph(key, num_nodes, edge_prob=0.1):
    """Deterministic random digraph + ring so every node has >=1 in-neighbor.

    Returns:
      adj  : dense bf16 adjacency (exact for 0/1), A[i, j] = 1 iff edge j -> i
      norm : (N, 1) f32 precomputed D^{-1/2} with clamp(min=1), a static graph
             attribute reused on every forward (hoisted out of the kernel).
    """
    rand_adj = jax.random.uniform(key, (num_nodes, num_nodes)) < edge_prob
    idx = jnp.arange(num_nodes)
    ring = jnp.zeros((num_nodes, num_nodes), bool).at[idx, (idx - 1) % num_nodes].set(True)
    adj = jnp.logical_or(rand_adj, ring)
    adj = adj.at[idx, idx].set(False)  # no self-loops (DGL does not add them)
    deg = jnp.sum(adj.astype(jnp.float32), axis=1, keepdims=True)      # in-degrees
    norm = lax.rsqrt(jnp.maximum(deg, 1.0))                            # D^{-1/2}
    return adj.astype(jnp.bfloat16), norm


if __name__ == "__main__":
    num_nodes = 64
    in_feats, h_feats, num_classes = 32, 32, 16  # h_feats unused by SGC (k=1)

    key = jax.random.PRNGKey(0)
    k_graph, k_feat, k_param = jax.random.split(key, 3)

    adj, norm = make_graph(k_graph, num_nodes)                            # (64,64) bf16, (64,1) f32
    x_f32 = jax.random.normal(k_feat, (num_nodes, in_feats), jnp.float32)
    x = x_f32.astype(jnp.bfloat16)                                        # bf16 feature stream
    params = init_params(k_param, in_feats, num_classes)

    out = sgc_forward(adj, x, norm, params)
    out = jax.block_until_ready(out)
    assert out.shape == (num_nodes, num_classes)

    # Pure-JAX reference (same bf16 weights/features, f32 math) — loose tol
    # because activations pass through bf16 inside the kernel.
    a_f = adj.astype(jnp.float32)
    ref = (norm * (a_f @ (x.astype(jnp.float32) * norm))) @ \
        params["w_pad"].astype(jnp.float32)[:, :num_classes] + \
        params["b_pad"][:, :num_classes]
    assert jnp.max(jnp.abs(out - ref)) < 5e-2

    print("KERNEL_OK")
</pallas_src>

<mosaic_0001>
module attributes {stable_mosaic.version = 11 : i64} {
  func.func @_sgc_prop_first_kernel(%arg0: memref<64x64xbf16, #tpu.memory_space<vmem>>, %arg1: memref<64x32xbf16, #tpu.memory_space<vmem>>, %arg2: memref<64x1xf32, #tpu.memory_space<vmem>>, %arg3: memref<32x128xbf16, #tpu.memory_space<vmem>>, %arg4: memref<1x128xf32, #tpu.memory_space<vmem>>, %arg5: memref<64x128xf32, #tpu.memory_space<vmem>>) attributes {dimension_semantics = [], scalar_prefetch = 0 : i64, scratch_operands = 0 : i64, tpu.core_type = #tpu.core_type<tc>} {
    %c0 = arith.constant 0 : index
    %c0_0 = arith.constant 0 : index
    %0 = vector.load %arg2[%c0, %c0_0] : memref<64x1xf32, #tpu.memory_space<vmem>>, vector<64x1xf32>
    %c0_1 = arith.constant 0 : index
    %c0_2 = arith.constant 0 : index
    %1 = vector.load %arg1[%c0_1, %c0_2] : memref<64x32xbf16, #tpu.memory_space<vmem>>, vector<64x32xbf16>
    %2 = arith.extf %1 : vector<64x32xbf16> to vector<64x32xf32>
    %3 = vector.broadcast %0 : vector<64x1xf32> to vector<64x32xf32>
    %4 = arith.mulf %2, %3 : vector<64x32xf32>
    %5 = arith.truncf %4 : vector<64x32xf32> to vector<64x32xbf16>
    %c0_3 = arith.constant 0 : index
    %c0_4 = arith.constant 0 : index
    %6 = vector.load %arg0[%c0_3, %c0_4] : memref<64x64xbf16, #tpu.memory_space<vmem>>, vector<64x64xbf16>
    %cst = arith.constant dense<0.000000e+00> : vector<64x32xf32>
    %7 = tpu.matmul %6, %5, %cst {dimension_numbers = #tpu.dot_dimension_numbers<[1], [0], [0], [1], [0, 0, 1, 1], [], []>} : vector<64x64xbf16>, vector<64x32xbf16>, vector<64x32xf32> -> vector<64x32xf32>
    %8 = vector.broadcast %0 : vector<64x1xf32> to vector<64x32xf32>
    %9 = arith.mulf %7, %8 : vector<64x32xf32>
    %10 = arith.truncf %9 : vector<64x32xf32> to vector<64x32xbf16>
    %c0_5 = arith.constant 0 : index
    %c0_6 = arith.constant 0 : index
    %11 = vector.load %arg3[%c0_5, %c0_6] : memref<32x128xbf16, #tpu.memory_space<vmem>>, vector<32x128xbf16>
    %cst_7 = arith.constant dense<0.000000e+00> : vector<64x128xf32>
    %12 = tpu.matmul %10, %11, %cst_7 {dimension_numbers = #tpu.dot_dimension_numbers<[1], [0], [0], [1], [0, 0, 1, 1], [], []>} : vector<64x32xbf16>, vector<32x128xbf16>, vector<64x128xf32> -> vector<64x128xf32>
    %c0_8 = arith.constant 0 : index
    %c0_9 = arith.constant 0 : index
    %13 = vector.load %arg4[%c0_8, %c0_9] : memref<1x128xf32, #tpu.memory_space<vmem>>, vector<1x128xf32>
    %14 = vector.broadcast %13 : vector<1x128xf32> to vector<64x128xf32>
    %15 = arith.addf %12, %14 : vector<64x128xf32>
    %c0_10 = arith.constant 0 : index
    %c0_11 = arith.constant 0 : index
    %16 = vector.load %arg5[%c0_10, %c0_11] : memref<64x128xf32, #tpu.memory_space<vmem>>, vector<64x128xf32>
    tpu.vector_store %arg5[%c0_10, %c0_11], %15 {strides = array<i32>} : memref<64x128xf32, #tpu.memory_space<vmem>>, vector<64x128xf32>,
    return
  }
}

</mosaic_0001>

<bundles_post_ra>
// kernel: _sgc_forward.1
= control target key start
LH: loop header
LB: loop body
LE: loop exit
PB: predicated region body
PF: predicated region fallthrough
CT: control target
= control target key end

     0   :  { %v321_v0 = vmov 0   ;;  %vm125_vm0 = vcmask 523264   ;;  %vm199_vm1 = vcmask 261120   ;;  %s457_s2 = inlined_call_operand.vmem [shape: f32[64,1], index: 2, kind: input, shape index: {}]   ;;  %s458_s1 = inlined_call_operand.vmem [shape: bf16[64,32], index: 1, kind: input, shape index: {}]   ;;  %s459_s0 = inlined_call_operand.vmem [shape: bf16[64,64], index: 0, kind: input, shape index: {}]   ;;  %s460_s4 = inlined_call_operand.vmem [shape: f32[1,128], index: 4, kind: input, shape index: {}]   ;;  %s461_s3 = inlined_call_operand.vmem [shape: bf16[32,128], index: 3, kind: input, shape index: {}]   ;;  %s462_s5 = inlined_call_operand.vmem [shape: f32[64,128], index: 5, kind: output, shape index: {}]  }
   0x1   :  { %318 = vset.pattern.permute.xlu1 %v321_v0  ;;  %317 = vset.pattern.permute.xlu0 %v321_v0  ;;  %v27_v1 = vld [vmem:[%s457_s2 + $0x30] sm:$0xff]  ;;  %v25_v2 = vld [vmem:[%s457_s2 + $0x20] sm:$0xff]  ;;  %v28_v4 = vld [vmem:[%s457_s2 + $0x38] sm:$0xff] }
   0x2   :  { %77 = vperm.xlu0 %317, %v27_v1   ;;  %67 = vperm.xlu1 %318, %v25_v2   ;;  %v23_v3 = vld [vmem:[%s457_s2 + $0x10] sm:$0xff]  ;;  %v26_v5 = vld [vmem:[%s457_s2 + $0x28] sm:$0xff]  ;;  %v24_v6 = vld [vmem:[%s457_s2 + $0x18] sm:$0xff] }
   0x3   :  { %319 = vset.pattern.permute.xlu2 %v321_v0  ;;  %v22_v7 = vld [vmem:[%s457_s2 + $0x8] sm:$0xff]  ;;  %v21_v8 = vld [vmem:[%s457_s2] sm:$0xff]  ;;  %v309_v11 = vld [vmem:[%s458_s1 + $0x18] sm:$0xff]  }
   0x4   :  { %57 = vperm.xlu2 %319, %v23_v3   ;;  %v305_v13 = vunpack.c.l.bf16 %v309_v11  ;;  %v306_v14 = vunpack.c.h.bf16 %v309_v11  ;;  %v308_v15 = vld [vmem:[%s458_s1 + $0x10] sm:$0xff]   ;;  %v307_v16 = vld [vmem:[%s458_s1 + $0x8] sm:$0xff]   ;;  %v292_v28 = vld [vmem:[%s458_s1] sm:$0xff]  }
   0x5   :  { %v302_v17 = vunpack.c.h.bf16 %v308_v15  ;;  %v301_v21 = vunpack.c.l.bf16 %v308_v15  ;;  %v297_v23 = vunpack.c.l.bf16 %v307_v16  ;;  %v298_v25 = vunpack.c.h.bf16 %v307_v16  ;;  %v285_v41 = vld [vmem:[%s459_s0] sm:$0xff]  ;;  %v287_v42 = vld [vmem:[%s459_s0 + $0x10] sm:$0xff]  ;;  %v286_v43 = vld [vmem:[%s459_s0 + $0x8] sm:$0xff] }
   0x6   :  { %v294_v32 = vunpack.c.h.bf16 %v292_v28  ;;  %v293_v33 = vunpack.c.l.bf16 %v292_v28  ;;  %v288_v44 = vld [vmem:[%s459_s0 + $0x18] sm:$0xff]  ;;  %v290_v45 = vld [vmem:[%s461_s3 + $0x8] sm:$0xff]  ;;  %v289_v46 = vld [vmem:[%s461_s3] sm:$0xff] }
   0x7   :  { %218 = vmatpush.bf16.msra.mxu1 %v290_v45  ;;  %314 = vmatpush.bf16.msra.mxu3 %v290_v45  ;;  %v320_v3 = vld [vmem:[%s460_s4] ss:$0 sm:$0xff] }
   0xa   :  { %82 = vperm.xlu0 %317, %v28_v4   ;;  %72 = vperm.xlu1 %318, %v26_v5  }
   0xb   :  { %219 = vmatpush.bf16.msra.mxu1 %v289_v46  ;;  %315 = vmatpush.bf16.msra.mxu3 %v289_v46 }
   0xc   :  { %62 = vperm.xlu2 %319, %v24_v6  }
  0x12   :  { %52 = vperm.xlu1 %318, %v22_v7   ;;  %47 = vperm.xlu0 %317, %v21_v8  }
  0x5e   :  { %v383_v12 = vpop.permute.xlu2 %57 }
  0x5f   :  { %v87_v30 = vmul.f32 %v297_v23, %v383_v12 }
  0x66   :  { %v63_v27 = vpop.permute.xlu2 %62 }
  0x67   :  { %v88_v31 = vmul.f32 %v298_v25, %v63_v27 }
  0x69   :  { %v94_v39 = vpack.c.bf16 %v88_v31, %v87_v30 }
  0x74   :  { %v376_v9 = vpop.permute.xlu0 %77  ;;  %v378_v10 = vpop.permute.xlu1 %67 }
  0x75   :  { %v91_v20 = vmul.f32 %v305_v13, %v376_v9  ;;  %v89_v29 = vmul.f32 %v301_v21, %v378_v10 }
  0x7c   :  { %v391_v18 = vpop.permute.xlu0 %82  ;;  %v393_v19 = vpop.permute.xlu1 %72 }
  0x7d   :  { %v92_v22 = vmul.f32 %v306_v14, %v391_v18  ;;  %v90_v24 = vmul.f32 %v302_v17, %v393_v19 }
  0x7f   :  { %v96_v26 = vpack.c.bf16 %v92_v22, %v91_v20  ;;  %v95_v34 = vpack.c.bf16 %v90_v24, %v89_v29 }
  0x81   :  { %142 = vmatpush.bf16.msra.mxu0 %v96_v26  ;;  %310 = vmatpush.bf16.msra.mxu2 %v96_v26 }
  0x84   :  { %v53_v35 = vpop.permute.xlu1 %52  ;;  %v48_v36 = vpop.permute.xlu0 %47 }
  0x85   :  { %143 = vmatpush.bf16.msra.mxu0 %v95_v34  ;;  %311 = vmatpush.bf16.msra.mxu2 %v95_v34  ;;  %v86_v37 = vmul.f32 %v294_v32, %v53_v35  ;;  %v85_v38 = vmul.f32 %v293_v33, %v48_v36 }
  0x87   :  { %v93_v40 = vpack.c.bf16 %v86_v37, %v85_v38 }
  0x89   :  { %144 = vmatpush.bf16.msra.mxu0 %v94_v39  ;;  %312 = vmatpush.bf16.msra.mxu2 %v94_v39 }
  0x8d   :  { %145 = vmatpush.bf16.msra.mxu0 %v93_v40  ;;  %313 = vmatpush.bf16.msra.mxu2 %v93_v40 }
  0x90   :  { %269 = vmatmul.msk.bf16.vlgmr.msra.gmra.mxu0 %vm125_vm0, %v285_v41  ;;  %271 = vmatmul.msk.bf16.vlgmr.msra.gmra.mxu2 %vm125_vm0, %v287_v42 }
  0xa0   :  { %270 = vmatmul.msk.bf16.gmra.mxu0 %vm125_vm0, %v286_v43  ;;  %272 = vmatmul.msk.bf16.gmra.mxu2 %vm125_vm0, %v288_v44 }
 0x10d   :  { %v147_v47 = vpop.f32.mrf.mxu0 }
 0x10e   :  { %v167_v49 = vmul.f32 %v147_v47, %v48_v36 }
 0x113   :  { %v157_v53 = vpop.f32.mrf.mxu2 }
 0x114   :  { %v171_v60 = vmul.f32 %v157_v53, %v378_v10 }
 0x115   :  { %v149_v48 = vpop.f32.mrf.mxu0 }
 0x116   :  { %v168_v50 = vmul.f32 %v149_v48, %v53_v35 }
 0x118   :  { %v175_v51 = vpack.c.bf16 %v168_v50, %v167_v49 }
 0x11a   :  { %281 = vmatmul.msk.bf16.vlgmr.msra.gmra.mxu1 %vm199_vm1, %v175_v51 }
 0x11b   :  { %v159_v58 = vpop.f32.mrf.mxu2 }
 0x11c   :  { %v172_v59 = vmul.f32 %v159_v58, %v393_v19 }
 0x11d   :  { %v152_v52 = vpop.f32.mrf.mxu0 }
 0x11e   :  { %v169_v55 = vmul.f32 %v152_v52, %v383_v12  ;;  %v177_v62 = vpack.c.bf16 %v172_v59, %v171_v60 }
 0x123   :  { %v162_v61 = vpop.f32.mrf.mxu2 }
 0x124   :  { %v173_v1 = vmul.f32 %v162_v61, %v376_v9 }
 0x125   :  { %v154_v54 = vpop.f32.mrf.mxu0 }
 0x126   :  { %v170_v56 = vmul.f32 %v154_v54, %v63_v27 }
 0x128   :  { %v176_v57 = vpack.c.bf16 %v170_v56, %v169_v55 }
 0x12a   :  { %282 = vmatmul.msk.bf16.vlgmr.msra.gmra.mxu3 %vm199_vm1, %v176_v57 }
 0x12b   :  { %v164_v63 = vpop.f32.mrf.mxu2 }
 0x12c   :  { %v174_v0 = vmul.f32 %v164_v63, %v391_v18 }
 0x12e   :  { %v178_v2 = vpack.c.bf16 %v174_v0, %v173_v1 }
 0x13a   :  { %283 = vmatmul.msk.bf16.gmra.mxu3 %vm199_vm1, %v177_v62 }
 0x14a   :  { %284 = vmatmul.msk.bf16.gmra.mxu3 %vm199_vm1, %v178_v2 }
 0x197   :  { %v221_v4 = vpop.f32.mrf.mxu1 }
 0x198   :  { %v222_v5 = vadd.f32 %v320_v3, %v221_v4 }
 0x19a   :  { %241 = vst [vmem:[%s462_s5] sm:$0xff] %v222_v5 }
 0x19f   :  { %v223_v6 = vpop.f32.mrf.mxu1 }
 0x1a0   :  { %v224_v7 = vadd.f32 %v320_v3, %v223_v6 }
 0x1a2   :  { %242 = vst [vmem:[%s462_s5 + $0x8] sm:$0xff] %v224_v7 }
 0x1ad   :  { %v226_v8 = vpop.f32.mrf.mxu3 }
 0x1ae   :  { %v227_v9 = vadd.f32 %v320_v3, %v226_v8 }
 0x1b0   :  { %243 = vst [vmem:[%s462_s5 + $0x10] sm:$0xff] %v227_v9 }
 0x1b5   :  { %v228_v10 = vpop.f32.mrf.mxu3 }
 0x1b6   :  { %v229_v11 = vadd.f32 %v320_v3, %v228_v10 }
 0x1b8   :  { %244 = vst [vmem:[%s462_s5 + $0x18] sm:$0xff] %v229_v11 }
 0x1bd   :  { %v231_v12 = vpop.f32.mrf.mxu3 }
 0x1be   :  { %v232_v13 = vadd.f32 %v320_v3, %v231_v12 }
 0x1c0   :  { %245 = vst [vmem:[%s462_s5 + $0x20] sm:$0xff] %v232_v13 }
 0x1c5   :  { %v233_v14 = vpop.f32.mrf.mxu3 }
 0x1c6   :  { %v234_v15 = vadd.f32 %v320_v3, %v233_v14 }
 0x1c8   :  { %246 = vst [vmem:[%s462_s5 + $0x28] sm:$0xff] %v234_v15 }
 0x1cd   :  { %v236_v16 = vpop.f32.mrf.mxu3 }
 0x1ce   :  { %v237_v17 = vadd.f32 %v320_v3, %v236_v16 }
 0x1d0   :  { %247 = vst [vmem:[%s462_s5 + $0x30] sm:$0xff] %v237_v17 }
 0x1d5   :  { %v238_v18 = vpop.f32.mrf.mxu3 }
 0x1d6   :  { %v239_v19 = vadd.f32 %v320_v3, %v238_v18 }
 0x1d8   :  { %248 = vst [vmem:[%s462_s5 + $0x38] sm:$0xff] %v239_v19 }

</bundles_post_ra>
